<compile_context>
chip_gen: v6e
topology: v6e:2x2x1
jax: 0.10.0
libtpu: 0.0.40
codegen_flags: <defaults>
</compile_context>

<pallas_src>
import jax
import jax.numpy as jnp
from jax import lax
from jax.experimental import pallas as pl
from jax.experimental.pallas import tpu as pltpu


def _shift(x, s, axis):
    """out[..., i, ...] = x[..., i + s, ...] if in range else 0   (s in {-1, 0, 1}).

    Implemented as slice + concat with a single zero row/column — unambiguous
    boundary semantics and no padded halo buffer.
    """
    if s == 0:
        return x
    size = x.shape[axis]
    zshape = list(x.shape)
    zshape[axis] = 1
    zero = jnp.zeros(zshape, x.dtype)
    if s > 0:
        return jnp.concatenate([lax.slice_in_dim(x, s, size, axis=axis), zero],
                               axis=axis)
    return jnp.concatenate([zero, lax.slice_in_dim(x, 0, size + s, axis=axis)],
                           axis=axis)


def _frelu_kernel(x_ref, w_ref, g_ref, b_ref, o_ref):
    """One grid step == one block of `cb` channels, NCHW layout.

    x_ref: (N, Cb, H, W)   VMEM  input block (read exactly once from HBM)
    w_ref: (C*9,)          SMEM  depthwise 3x3 taps, channel-major flat
    g_ref: (C,)            SMEM  BN gamma
    b_ref: (C,)            SMEM  BN beta
    o_ref: (N, Cb, H, W)   VMEM  output block (written exactly once to HBM)
    """
    n, cb, h, wd = x_ref.shape
    inv_cnt = 1.0 / float(n * h * wd)
    c0 = pl.program_id(0) * cb

    @pl.loop(0, cb)
    def _(ci):
        ch = c0 + ci                                           # global channel
        xc = x_ref[:, pl.ds(ci, 1), :, :].astype(jnp.float32)  # (N, 1, H, W)

        # ---- depthwise 3x3 conv, stride 1, zero pad 1 (cross-correlation) ----
        # H shifts first (3 slabs), W shift per tap; z is seeded by the first
        # tap product, so there is no zero-init pass over the slab.
        rows = [_shift(xc, di - 1, axis=2) for di in range(3)]
        z = None
        for di in range(3):
            for dj in range(3):
                tap = w_ref[ch * 9 + di * 3 + dj]              # scalar from SMEM
                term = _shift(rows[di], dj - 1, axis=3) * tap
                z = term if z is None else z + term
        # conv bias intentionally omitted: training-mode BatchNorm's batch-mean
        # subtraction cancels any per-channel constant bias exactly.

        # ---- BatchNorm2d (training mode), centered two-pass statistics -------
        mean = jnp.sum(z, axis=(0, 1, 2, 3), keepdims=True) * inv_cnt
        d = z - mean
        var = jnp.sum(d * d, axis=(0, 1, 2, 3), keepdims=True) * inv_cnt
        scale = g_ref[ch] * lax.rsqrt(var + 1e-5)              # (1,1,1,1)
        bias = b_ref[ch] - scale * mean                        # (1,1,1,1)

        # ---- funnel activation ------------------------------------------------
        o_ref[:, pl.ds(ci, 1), :, :] = jnp.maximum(
            xc, z * scale + bias).astype(o_ref.dtype)


def _vmem_limit_bytes():
    """Generation-aware VMEM request (v7x: 64 MiB/TC, v5e/v6e: 128 MiB)."""
    cap = 64 * 1024 * 1024                       # conservative default (v7x)
    try:
        cap = int(pltpu.get_tpu_info().vmem_capacity_bytes)
    except Exception:
        pass
    # Request ~5/8 of physical VMEM, leaving headroom for compiler scratch:
    # 40 MiB on v7x, 80 MiB on v5e/v6e.
    return int(min(max(cap * 5 // 8, 32 * 1024 * 1024), 100 * 1024 * 1024))


def _pick_channel_block(n, c, h, w, itemsize, vmem_limit_bytes):
    """Channel block size: big blocks (amortize ~0.35us/step), but always
    >= min(4, C) grid steps (v7x megacore + pipeline overlap), and the
    double-buffered in/out blocks plus f32 temporaries must fit the budget."""
    per_ch = n * h * w * max(int(itemsize), 4)   # temporaries are f32
    # ~1/8 of the VMEM limit for the x block: 2x in + 2x out double buffers
    # plus a handful of per-channel f32 temporaries stays well under the limit.
    block_budget = max(per_ch, vmem_limit_bytes // 8)
    min_steps = min(4, c)
    cb_cap = max(1, c // max(1, min_steps))
    cb = int(max(1, min(block_budget // per_ch, cb_cap)))
    while c % cb:                                # largest divisor of C <= cb
        cb -= 1
    return cb


@jax.jit
def frelu(x, conv_w, conv_b, bn_gamma, bn_beta):
    """FReLU forward: max(x, BN_train(depthwise_conv3x3(x))).

    x: (N, C, H, W); conv_w: (C, 3, 3); conv_b / bn_gamma / bn_beta: (C,).
    Input and output stay NCHW — no host-side layout transposes.
    conv_b is accepted for API parity with nn.Conv2d(bias=True) but is unused:
    training-mode BatchNorm's batch-mean subtraction cancels it exactly.
    """
    del conv_b
    n, c, h, w = x.shape

    w_flat = conv_w.reshape(c * 9).astype(jnp.float32)   # channel-major taps
    gamma = bn_gamma.reshape(c).astype(jnp.float32)
    beta = bn_beta.reshape(c).astype(jnp.float32)

    vlim = _vmem_limit_bytes()
    cb = _pick_channel_block(n, c, h, w, x.dtype.itemsize, vlim)
    grid = (c // cb,)

    smem_spec = pl.BlockSpec(memory_space=pltpu.MemorySpace.SMEM)

    # TODO(synk): for shapes where a single channel's (N, H, W) slab no longer
    # fits VMEM (very large N*H*W), add an H-tiled second grid axis with a
    # 1-row halo and switch BN to a two-pass accumulate-then-normalize form.
    return pl.pallas_call(
        _frelu_kernel,
        out_shape=jax.ShapeDtypeStruct((n, c, h, w), x.dtype),
        grid=grid,
        in_specs=[
            pl.BlockSpec((n, cb, h, w), lambda i: (0, i, 0, 0)),  # x, read once
            smem_spec,                                            # conv taps
            smem_spec,                                            # bn gamma
            smem_spec,                                            # bn beta
        ],
        out_specs=pl.BlockSpec((n, cb, h, w), lambda i: (0, i, 0, 0)),
        compiler_params=pltpu.CompilerParams(
            dimension_semantics=("parallel",),
            vmem_limit_bytes=vlim),
    )(x, w_flat, gamma, beta)


def _frelu_reference(x, conv_w, conv_b, bn_gamma, bn_beta):
    """Pure-JAX reference (depthwise conv + training-mode BN + max)."""
    n, c, h, w = x.shape
    kern = conv_w.reshape(c, 1, 3, 3)
    z = lax.conv_general_dilated(
        x, kern, window_strides=(1, 1), padding=((1, 1), (1, 1)),
        dimension_numbers=("NCHW", "OIHW", "NCHW"), feature_group_count=c)
    z = z + conv_b.reshape(1, c, 1, 1)
    mean = jnp.mean(z, axis=(0, 2, 3), keepdims=True)
    var = jnp.mean((z - mean) ** 2, axis=(0, 2, 3), keepdims=True)
    z_hat = (z - mean) * lax.rsqrt(var + 1e-5)
    y = bn_gamma.reshape(1, c, 1, 1) * z_hat + bn_beta.reshape(1, c, 1, 1)
    return jnp.maximum(x, y)


if __name__ == "__main__":
    key = jax.random.PRNGKey(0)
    k_x, k_w, k_b = jax.random.split(key, 3)

    N, C, H, W = 2, 4, 16, 16
    x = jax.random.normal(k_x, (N, C, H, W), dtype=jnp.float32)

    # Deterministic parameter init mirroring nn.Conv2d / nn.BatchNorm2d defaults:
    # conv weight/bias ~ U(-1/3, 1/3) (fan_in = 1*3*3), BN gamma = 1, beta = 0.
    bound = 1.0 / 3.0
    conv_w = jax.random.uniform(k_w, (C, 3, 3), minval=-bound, maxval=bound,
                                dtype=jnp.float32)
    conv_b = jax.random.uniform(k_b, (C,), minval=-bound, maxval=bound,
                                dtype=jnp.float32)
    bn_gamma = jnp.ones((C,), jnp.float32)
    bn_beta = jnp.zeros((C,), jnp.float32)

    out = jax.block_until_ready(frelu(x, conv_w, conv_b, bn_gamma, bn_beta))

    ref = _frelu_reference(x, conv_w, conv_b, bn_gamma, bn_beta)
    assert out.shape == (N, C, H, W)
    assert jnp.allclose(out, ref, atol=1e-4, rtol=1e-4), "mismatch vs reference"

    print("KERNEL_OK")
</pallas_src>

<mosaic_0001>
module attributes {stable_mosaic.version = 11 : i64} {
  func.func @_frelu_kernel(%arg0: i32, %arg1: memref<2x1x16x16xf32, #tpu.memory_space<vmem>>, %arg2: memref<36xf32, #tpu.memory_space<smem>>, %arg3: memref<4xf32, #tpu.memory_space<smem>>, %arg4: memref<4xf32, #tpu.memory_space<smem>>, %arg5: memref<2x1x16x16xf32, #tpu.memory_space<vmem>>) attributes {dimension_semantics = [#tpu.dimension_semantics<parallel>], iteration_bounds = array<i64: 4>, scalar_prefetch = 0 : i64, scratch_operands = 0 : i64, tpu.core_type = #tpu.core_type<tc>, window_params = [{transform_indices = @transform_0, window_bounds = array<i64: 2, 1, 16, 16>}, {transform_indices = @transform_1, window_bounds = array<i64: 36>}, {transform_indices = @transform_2, window_bounds = array<i64: 4>}, {transform_indices = @transform_3, window_bounds = array<i64: 4>}, {transform_indices = @transform_4, window_bounds = array<i64: 2, 1, 16, 16>}]} {
    %c1_i32 = arith.constant 1 : i32
    %0 = arith.muli %arg0, %c1_i32 : i32
    %c0_i32 = arith.constant 0 : i32
    %c1_i32_0 = arith.constant 1 : i32
    %1 = arith.muli %c0_i32, %c1_i32_0 : i32
    %c0_i32_1 = arith.constant 0 : i32
    %2 = arith.addi %c0_i32_1, %1 : i32
    %3 = arith.addi %0, %2 : i32
    %c0 = arith.constant 0 : index
    %4 = arith.index_cast %2 : i32 to index
    %c0_2 = arith.constant 0 : index
    %c0_3 = arith.constant 0 : index
    %5 = vector.load %arg1[%c0, %4, %c0_2, %c0_3] : memref<2x1x16x16xf32, #tpu.memory_space<vmem>>, vector<2x1x16x16xf32>
    %cst = arith.constant 0.000000e+00 : f32
    %6 = vector.broadcast %cst : f32 to vector<2x1x1x16xf32>
    %7 = vector.extract_strided_slice %5 {offsets = [0, 0, 0, 0], sizes = [2, 1, 15, 16], strides = [1, 1, 1, 1]} : vector<2x1x16x16xf32> to vector<2x1x15x16xf32>
    %8 = tpu.concatenate %6, %7 in 2 : vector<2x1x1x16xf32>, vector<2x1x15x16xf32> -> vector<2x1x16x16xf32>
    %cst_4 = arith.constant 0.000000e+00 : f32
    %9 = vector.broadcast %cst_4 : f32 to vector<2x1x1x16xf32>
    %10 = vector.extract_strided_slice %5 {offsets = [0, 0, 1, 0], sizes = [2, 1, 15, 16], strides = [1, 1, 1, 1]} : vector<2x1x16x16xf32> to vector<2x1x15x16xf32>
    %11 = tpu.concatenate %10, %9 in 2 : vector<2x1x15x16xf32>, vector<2x1x1x16xf32> -> vector<2x1x16x16xf32>
    %c9_i32 = arith.constant 9 : i32
    %12 = arith.muli %3, %c9_i32 : i32
    %c0_i32_5 = arith.constant 0 : i32
    %13 = arith.addi %12, %c0_i32_5 : i32
    %c0_i32_6 = arith.constant 0 : i32
    %14 = arith.addi %13, %c0_i32_6 : i32
    %15 = arith.index_cast %14 : i32 to index
    %16 = memref.load %arg2[%15] : memref<36xf32, #tpu.memory_space<smem>>
    %cst_7 = arith.constant 0.000000e+00 : f32
    %17 = vector.broadcast %cst_7 : f32 to vector<2x1x16x1xf32>
    %18 = vector.extract_strided_slice %8 {offsets = [0, 0, 0, 0], sizes = [2, 1, 16, 15], strides = [1, 1, 1, 1]} : vector<2x1x16x16xf32> to vector<2x1x16x15xf32>
    %19 = tpu.concatenate %17, %18 in 3 : vector<2x1x16x1xf32>, vector<2x1x16x15xf32> -> vector<2x1x16x16xf32>
    %20 = vector.broadcast %16 : f32 to vector<2x1x16x16xf32>
    %21 = arith.mulf %19, %20 : vector<2x1x16x16xf32>
    %c9_i32_8 = arith.constant 9 : i32
    %22 = arith.muli %3, %c9_i32_8 : i32
    %c0_i32_9 = arith.constant 0 : i32
    %23 = arith.addi %22, %c0_i32_9 : i32
    %c1_i32_10 = arith.constant 1 : i32
    %24 = arith.addi %23, %c1_i32_10 : i32
    %25 = arith.index_cast %24 : i32 to index
    %26 = memref.load %arg2[%25] : memref<36xf32, #tpu.memory_space<smem>>
    %27 = vector.broadcast %26 : f32 to vector<2x1x16x16xf32>
    %28 = arith.mulf %8, %27 : vector<2x1x16x16xf32>
    %29 = arith.addf %21, %28 : vector<2x1x16x16xf32>
    %c9_i32_11 = arith.constant 9 : i32
    %30 = arith.muli %3, %c9_i32_11 : i32
    %c0_i32_12 = arith.constant 0 : i32
    %31 = arith.addi %30, %c0_i32_12 : i32
    %c2_i32 = arith.constant 2 : i32
    %32 = arith.addi %31, %c2_i32 : i32
    %33 = arith.index_cast %32 : i32 to index
    %34 = memref.load %arg2[%33] : memref<36xf32, #tpu.memory_space<smem>>
    %cst_13 = arith.constant 0.000000e+00 : f32
    %35 = vector.broadcast %cst_13 : f32 to vector<2x1x16x1xf32>
    %36 = vector.extract_strided_slice %8 {offsets = [0, 0, 0, 1], sizes = [2, 1, 16, 15], strides = [1, 1, 1, 1]} : vector<2x1x16x16xf32> to vector<2x1x16x15xf32>
    %37 = tpu.concatenate %36, %35 in 3 : vector<2x1x16x15xf32>, vector<2x1x16x1xf32> -> vector<2x1x16x16xf32>
    %38 = vector.broadcast %34 : f32 to vector<2x1x16x16xf32>
    %39 = arith.mulf %37, %38 : vector<2x1x16x16xf32>
    %40 = arith.addf %29, %39 : vector<2x1x16x16xf32>
    %c9_i32_14 = arith.constant 9 : i32
    %41 = arith.muli %3, %c9_i32_14 : i32
    %c3_i32 = arith.constant 3 : i32
    %42 = arith.addi %41, %c3_i32 : i32
    %c0_i32_15 = arith.constant 0 : i32
    %43 = arith.addi %42, %c0_i32_15 : i32
    %44 = arith.index_cast %43 : i32 to index
    %45 = memref.load %arg2[%44] : memref<36xf32, #tpu.memory_space<smem>>
    %cst_16 = arith.constant 0.000000e+00 : f32
    %46 = vector.broadcast %cst_16 : f32 to vector<2x1x16x1xf32>
    %47 = vector.extract_strided_slice %5 {offsets = [0, 0, 0, 0], sizes = [2, 1, 16, 15], strides = [1, 1, 1, 1]} : vector<2x1x16x16xf32> to vector<2x1x16x15xf32>
    %48 = tpu.concatenate %46, %47 in 3 : vector<2x1x16x1xf32>, vector<2x1x16x15xf32> -> vector<2x1x16x16xf32>
    %49 = vector.broadcast %45 : f32 to vector<2x1x16x16xf32>
    %50 = arith.mulf %48, %49 : vector<2x1x16x16xf32>
    %51 = arith.addf %40, %50 : vector<2x1x16x16xf32>
    %c9_i32_17 = arith.constant 9 : i32
    %52 = arith.muli %3, %c9_i32_17 : i32
    %c3_i32_18 = arith.constant 3 : i32
    %53 = arith.addi %52, %c3_i32_18 : i32
    %c1_i32_19 = arith.constant 1 : i32
    %54 = arith.addi %53, %c1_i32_19 : i32
    %55 = arith.index_cast %54 : i32 to index
    %56 = memref.load %arg2[%55] : memref<36xf32, #tpu.memory_space<smem>>
    %57 = vector.broadcast %56 : f32 to vector<2x1x16x16xf32>
    %58 = arith.mulf %5, %57 : vector<2x1x16x16xf32>
    %59 = arith.addf %51, %58 : vector<2x1x16x16xf32>
    %c9_i32_20 = arith.constant 9 : i32
    %60 = arith.muli %3, %c9_i32_20 : i32
    %c3_i32_21 = arith.constant 3 : i32
    %61 = arith.addi %60, %c3_i32_21 : i32
    %c2_i32_22 = arith.constant 2 : i32
    %62 = arith.addi %61, %c2_i32_22 : i32
    %63 = arith.index_cast %62 : i32 to index
    %64 = memref.load %arg2[%63] : memref<36xf32, #tpu.memory_space<smem>>
    %cst_23 = arith.constant 0.000000e+00 : f32
    %65 = vector.broadcast %cst_23 : f32 to vector<2x1x16x1xf32>
    %66 = vector.extract_strided_slice %5 {offsets = [0, 0, 0, 1], sizes = [2, 1, 16, 15], strides = [1, 1, 1, 1]} : vector<2x1x16x16xf32> to vector<2x1x16x15xf32>
    %67 = tpu.concatenate %66, %65 in 3 : vector<2x1x16x15xf32>, vector<2x1x16x1xf32> -> vector<2x1x16x16xf32>
    %68 = vector.broadcast %64 : f32 to vector<2x1x16x16xf32>
    %69 = arith.mulf %67, %68 : vector<2x1x16x16xf32>
    %70 = arith.addf %59, %69 : vector<2x1x16x16xf32>
    %c9_i32_24 = arith.constant 9 : i32
    %71 = arith.muli %3, %c9_i32_24 : i32
    %c6_i32 = arith.constant 6 : i32
    %72 = arith.addi %71, %c6_i32 : i32
    %c0_i32_25 = arith.constant 0 : i32
    %73 = arith.addi %72, %c0_i32_25 : i32
    %74 = arith.index_cast %73 : i32 to index
    %75 = memref.load %arg2[%74] : memref<36xf32, #tpu.memory_space<smem>>
    %cst_26 = arith.constant 0.000000e+00 : f32
    %76 = vector.broadcast %cst_26 : f32 to vector<2x1x16x1xf32>
    %77 = vector.extract_strided_slice %11 {offsets = [0, 0, 0, 0], sizes = [2, 1, 16, 15], strides = [1, 1, 1, 1]} : vector<2x1x16x16xf32> to vector<2x1x16x15xf32>
    %78 = tpu.concatenate %76, %77 in 3 : vector<2x1x16x1xf32>, vector<2x1x16x15xf32> -> vector<2x1x16x16xf32>
    %79 = vector.broadcast %75 : f32 to vector<2x1x16x16xf32>
    %80 = arith.mulf %78, %79 : vector<2x1x16x16xf32>
    %81 = arith.addf %70, %80 : vector<2x1x16x16xf32>
    %c9_i32_27 = arith.constant 9 : i32
    %82 = arith.muli %3, %c9_i32_27 : i32
    %c6_i32_28 = arith.constant 6 : i32
    %83 = arith.addi %82, %c6_i32_28 : i32
    %c1_i32_29 = arith.constant 1 : i32
    %84 = arith.addi %83, %c1_i32_29 : i32
    %85 = arith.index_cast %84 : i32 to index
    %86 = memref.load %arg2[%85] : memref<36xf32, #tpu.memory_space<smem>>
    %87 = vector.broadcast %86 : f32 to vector<2x1x16x16xf32>
    %88 = arith.mulf %11, %87 : vector<2x1x16x16xf32>
    %89 = arith.addf %81, %88 : vector<2x1x16x16xf32>
    %c9_i32_30 = arith.constant 9 : i32
    %90 = arith.muli %3, %c9_i32_30 : i32
    %c6_i32_31 = arith.constant 6 : i32
    %91 = arith.addi %90, %c6_i32_31 : i32
    %c2_i32_32 = arith.constant 2 : i32
    %92 = arith.addi %91, %c2_i32_32 : i32
    %93 = arith.index_cast %92 : i32 to index
    %94 = memref.load %arg2[%93] : memref<36xf32, #tpu.memory_space<smem>>
    %cst_33 = arith.constant 0.000000e+00 : f32
    %95 = vector.broadcast %cst_33 : f32 to vector<2x1x16x1xf32>
    %96 = vector.extract_strided_slice %11 {offsets = [0, 0, 0, 1], sizes = [2, 1, 16, 15], strides = [1, 1, 1, 1]} : vector<2x1x16x16xf32> to vector<2x1x16x15xf32>
    %97 = tpu.concatenate %96, %95 in 3 : vector<2x1x16x15xf32>, vector<2x1x16x1xf32> -> vector<2x1x16x16xf32>
    %98 = vector.broadcast %94 : f32 to vector<2x1x16x16xf32>
    %99 = arith.mulf %97, %98 : vector<2x1x16x16xf32>
    %100 = arith.addf %89, %99 : vector<2x1x16x16xf32>
    %101 = vector.shape_cast %100 : vector<2x1x16x16xf32> to vector<1x2x1x16x16xf32>
    %cst_34 = arith.constant dense<0.000000e+00> : vector<1xf32>
    %102 = vector.multi_reduction <add>, %101, %cst_34 [1, 2, 3, 4] : vector<1x2x1x16x16xf32> to vector<1xf32>
    %103 = vector.shape_cast %102 : vector<1xf32> to vector<1x1x1x1x1xf32>
    %104 = vector.extract %103[0, 0, 0, 0, 0] : f32 from vector<1x1x1x1x1xf32>
    %105 = vector.broadcast %104 : f32 to vector<1x1x1x1xf32>
    %cst_35 = arith.constant 0.001953125 : f32
    %106 = vector.broadcast %cst_35 : f32 to vector<1x1x1x1xf32>
    %107 = arith.mulf %105, %106 : vector<1x1x1x1xf32>
    %108 = vector.broadcast %107 : vector<1x1x1x1xf32> to vector<2x1x16x16xf32>
    %109 = arith.subf %100, %108 : vector<2x1x16x16xf32>
    %110 = arith.mulf %109, %109 : vector<2x1x16x16xf32>
    %111 = vector.shape_cast %110 : vector<2x1x16x16xf32> to vector<1x2x1x16x16xf32>
    %cst_36 = arith.constant dense<0.000000e+00> : vector<1xf32>
    %112 = vector.multi_reduction <add>, %111, %cst_36 [1, 2, 3, 4] : vector<1x2x1x16x16xf32> to vector<1xf32>
    %113 = vector.shape_cast %112 : vector<1xf32> to vector<1x1x1x1x1xf32>
    %114 = vector.extract %113[0, 0, 0, 0, 0] : f32 from vector<1x1x1x1x1xf32>
    %115 = vector.broadcast %114 : f32 to vector<1x1x1x1xf32>
    %cst_37 = arith.constant 0.001953125 : f32
    %116 = vector.broadcast %cst_37 : f32 to vector<1x1x1x1xf32>
    %117 = arith.mulf %115, %116 : vector<1x1x1x1xf32>
    %118 = arith.index_cast %3 : i32 to index
    %119 = memref.load %arg3[%118] : memref<4xf32, #tpu.memory_space<smem>>
    %cst_38 = arith.constant 9.99999974E-6 : f32
    %120 = vector.broadcast %cst_38 : f32 to vector<1x1x1x1xf32>
    %121 = arith.addf %117, %120 : vector<1x1x1x1xf32>
    %122 = math.rsqrt %121 : vector<1x1x1x1xf32>
    %123 = vector.broadcast %119 : f32 to vector<1x1x1x1xf32>
    %124 = arith.mulf %123, %122 : vector<1x1x1x1xf32>
    %125 = arith.index_cast %3 : i32 to index
    %126 = memref.load %arg4[%125] : memref<4xf32, #tpu.memory_space<smem>>
    %127 = arith.mulf %124, %107 : vector<1x1x1x1xf32>
    %128 = vector.broadcast %126 : f32 to vector<1x1x1x1xf32>
    %129 = arith.subf %128, %127 : vector<1x1x1x1xf32>
    %130 = vector.broadcast %124 : vector<1x1x1x1xf32> to vector<2x1x16x16xf32>
    %131 = arith.mulf %100, %130 : vector<2x1x16x16xf32>
    %132 = vector.broadcast %129 : vector<1x1x1x1xf32> to vector<2x1x16x16xf32>
    %133 = arith.addf %131, %132 : vector<2x1x16x16xf32>
    %134 = arith.maximumf %5, %133 : vector<2x1x16x16xf32>
    %c0_39 = arith.constant 0 : index
    %135 = arith.index_cast %2 : i32 to index
    %c0_40 = arith.constant 0 : index
    %c0_41 = arith.constant 0 : index
    %136 = vector.load %arg5[%c0_39, %135, %c0_40, %c0_41] : memref<2x1x16x16xf32, #tpu.memory_space<vmem>>, vector<2x1x16x16xf32>
    tpu.vector_store %arg5[%c0_39, %135, %c0_40, %c0_41], %134 {strides = array<i32>} : memref<2x1x16x16xf32, #tpu.memory_space<vmem>>, vector<2x1x16x16xf32>,
    %c1_i32_42 = arith.constant 1 : i32
    return
  }
  func.func @transform_0(%arg0: i32) -> (i32, i32, i32, i32) {
    %c0_i32 = arith.constant 0 : i32
    %c0_i32_0 = arith.constant 0 : i32
    %c0_i32_1 = arith.constant 0 : i32
    %c0_i32_2 = arith.constant 0 : i32
    return %c0_i32, %arg0, %c0_i32_0, %c0_i32_1 : i32, i32, i32, i32
  }
  func.func @transform_1(%arg0: i32) -> i32 {
    %c0_i32 = arith.constant 0 : i32
    %c0_i32_0 = arith.constant 0 : i32
    return %c0_i32 : i32
  }
  func.func @transform_2(%arg0: i32) -> i32 {
    %c0_i32 = arith.constant 0 : i32
    %c0_i32_0 = arith.constant 0 : i32
    return %c0_i32 : i32
  }
  func.func @transform_3(%arg0: i32) -> i32 {
    %c0_i32 = arith.constant 0 : i32
    %c0_i32_0 = arith.constant 0 : i32
    return %c0_i32 : i32
  }
  func.func @transform_4(%arg0: i32) -> (i32, i32, i32, i32) {
    %c0_i32 = arith.constant 0 : i32
    %c0_i32_0 = arith.constant 0 : i32
    %c0_i32_1 = arith.constant 0 : i32
    %c0_i32_2 = arith.constant 0 : i32
    return %c0_i32, %arg0, %c0_i32_0, %c0_i32_1 : i32, i32, i32, i32
  }
}

</mosaic_0001>

<bundles_post_ra>
// kernel: frelu.1
= control target key start
LH: loop header
LB: loop body
LE: loop exit
PB: predicated region body
PF: predicated region fallthrough
CT: control target
= control target key end

     0   :  { %9 = vsyncpa [#allocation3], 0  ;;  %s1343_s0 = inlined_call_operand.hbm [shape: f32[2,4,16,16], index: 0, kind: input, shape index: {}]   ;;  %s1344_s1 = inlined_call_operand.vmem [shape: f32[36], index: 1, kind: input, shape index: {}]   ;;  %s1345_s2 = inlined_call_operand.vmem [shape: f32[4], index: 2, kind: input, shape index: {}]   ;;  %s1346_s3 = inlined_call_operand.vmem [shape: f32[4], index: 3, kind: input, shape index: {}]   ;;  %s1347_s4 = inlined_call_operand.hbm [shape: f32[2,4,16,16], index: 4, kind: output, shape index: {}]  }
   0x1   :  { %11 = vsyncpa [#allocation3 + $0x1], 0 }
   0x2   :  { %12 = vsyncpa [#allocation5], 0 }
   0x3   :  { %13 = vsyncpa [#allocation8], 0 }
   0x4   :  { %14 = vsyncpa [#allocation4], 0 }
   0x5   :  { %16 = vsyncpa [#allocation4 + $0x1], 0  ;;  %s988_s15 = smov 0   ;;  %s990_s16 = smov 0  }
   0x6   :  { %s992_s17 = smov 0   ;;  %s994_s18 = smov 0  }
   0x7 LB: > { %s1009_s19 = sadd.s32 4294967295, %s943_s18   ;;  %s722_s20 = sadd.s32 4294967294, %s943_s18   ;;  %s943_s18 = sphi %s994_s18, %s1371_s18   ;;  %s939_s17 = sphi %s992_s17, %s1370_s17   ;;  %s935_s16 = sphi %s990_s16, %s1369_s16   ;;  %s931_s15 = sphi %s988_s15, %s1368_s15  }
   0x8   : > { %s1013_s21 = sadd.s32 1, %s943_s18   ;;  %s29_s22 = sadd.s32 1, %s939_s17 }
   0x9   : > { %s26_s23 = ssub.s32 %s943_s18, %s1013_s21  ;;  %p36_p0 = scmp.ne.s32.totalorder %s939_s17, %s935_s16 }
   0xa   : > { %p27_p1 = scmp.eq.s32.totalorder %s26_s23, 0  ;;  %p37_p2 = scmp.eq.s32.totalorder %s943_s18, 0 }
   0xb   : > { %p42_p3 = scmp.ne.s32.totalorder %s935_s16, %s931_s15  ;;  %p1348_p4 = scmp.eq.s32.totalorder %s1009_s19, 0 }
   0xc   : > { %s1025_s24 = scalar_select %p27_p1, %s939_s17, %s29_s22  }
   0xd   : > { %p1027_p5 = por %p37_p2, %p36_p0  ;;  %p1033_p6 = por %p1348_p4, %p42_p3 }
   0xe   : > { %p129_p7 = scmp.eq.s32.totalorder %s1009_s19, 3  ;;  %p135_p8 = scmp.eq.s32.totalorder %s722_s20, 3 }
   0xf   : > { %s1353_s25 = scalar_select %p1027_p5, 1, 0 }
  0x10   : > { %s1354_s26 = scalar_select %p1033_p6, 1, 0 }
  0x11   : > { %p723_p9 = scmp.ge.s32.totalorder %s943_s18, 1  ;;  %p142_p10 = scmp.lt.s32.totalorder %s943_s18, 5 }
  0x12   : > { %p1040_p11 = por %p129_p7, %p36_p0  ;;  %p1044_p12 = por %p135_p8, %p42_p3 }
  0x13   : > { %p1048_p13 = pnand %p723_p9, %p142_p10  ;;  %s166_s6 = sshll.u32 %s1345_s2, 4  ;;  %s167_s6 = int_to_ptr.vmem [resolvable:$true] %s166_s6 }
  0x14   : > { %s1355_s27 = scalar_select %p1040_p11, 1, 0 }
  0x15   : > { %s1356_s28 = scalar_select %p1044_p12, 1, 0 }
  0x16   : > { %s1357_s29 = scalar_select %p1048_p13, 1, 0 }
  0x17   : > { %p779_p1 = pneg %p1048_p13  ;;  %s155_s9 = sshll.u32 %s1344_s1, 4  ;;  %s156_s9 = int_to_ptr.vmem [resolvable:$true] %s155_s9 }
  0x18   : > { %s177_s13 = sshll.u32 %s1346_s3, 4  ;;  %s852_s14 = scalar_lea.vmem %s167_s6, 16  ;;  %s1069_s13 = int_to_ptr.vmem [resolvable:$true] %s177_s13 }
  0x19   : > { %p1062_p0 = pnand %p779_p1, %p1348_p4  ;;  %p853_p2 = scmp.ne.s32.totalorder %s167_s6, %s852_s14 }
  0x1a   : > { %p860_p9 = scmp.lt.s32.totalorder %s167_s6, %s167_s6  ;;  %p861_p10 = scmp.lt.s32.totalorder %s852_s14, %s852_s14 }
  0x1b   : > { %p854_p3 = pneg %p1062_p0 }
  0x1c   : > { %p862_p1 = por %p861_p10, %p860_p9 }
  0x1d   : > { %p855_p7 = pnand %p854_p3, %p853_p2 }
  0x1f   : > { %p856_p8 = pneg %p855_p7 }
  0x21   : > { %p863_p4 = pnand %p862_p1, %p856_p8 }
  0x23   : > { %866 = shalt.err (!%p863_p4)
}
  0x24   : > { %s945_s20 = smov [#allocation7]   ;;  %s867_s22 = scalar_lea.vmem %s156_s9, 16 }
  0x25   : > { %785 = dma.vmem_to_smem (!%p1062_p0), %s167_s6, 16, %s945_s20, [#allocation8]  }
  0x26   : > { %p868_p12 = scmp.ne.s32.totalorder %s156_s9, %s867_s22  ;;  %p875_p13 = scmp.lt.s32.totalorder %s156_s9, %s156_s9 }
  0x27   : > { %p876_p5 = scmp.lt.s32.totalorder %s867_s22, %s867_s22 }
  0x28   : > { %p870_p11 = pnand %p868_p12, %p854_p3 }
  0x29   : > { %p877_p2 = por %p876_p5, %p875_p13 }
  0x2a   : > { %p871_p6 = pneg %p870_p11 }
  0x2c   : > { %p878_p7 = pnand %p877_p2, %p871_p6 }
  0x2e   : > { %881 = shalt.err (!%p878_p7)
}
  0x2f   : > { %s946_s23 = smov [#allocation6]   ;;  %s882_s30 = scalar_lea.vmem %s1069_s13, 16 }
  0x30   : > { %782 = dma.vmem_to_smem (!%p1062_p0), %s156_s9, 16, %s946_s23, [#allocation5]  }
  0x31   : > { %p883_p4 = scmp.ne.s32.totalorder %s1069_s13, %s882_s30  ;;  %p890_p11 = scmp.lt.s32.totalorder %s1069_s13, %s1069_s13 }
  0x32   : > { %p891_p9 = scmp.lt.s32.totalorder %s882_s30, %s882_s30 }
  0x33   : > { %p885_p8 = pnand %p883_p4, %p854_p3 }
  0x34   : > { %p892_p5 = por %p891_p9, %p890_p11 }
  0x35   : > { %p886_p12 = pneg %p885_p8 }
  0x37   : > { %p893_p6 = pnand %p892_p5, %p886_p12 }
  0x39   : > { %896 = shalt.err (!%p893_p6)
}
  0x3a   : > { %s947_s5 = smov [#allocation9]   ;;  %p727_p13 = scmp.ge.s32.totalorder %s943_s18, 4 }
  0x3b   : > { %788 = dma.vmem_to_smem (!%p1062_p0), %s1069_s13, 16, %s947_s5, [#allocation8]  }
  0x3c   : > { %184 = sbr.rel (%p727_p13) target bundleno = 80 (0x50), region = 28 }
  0x41   : > { %s188_s6 = sand.u32 1, %s939_s17   ;;  %s744_s7 = sshll.u32 %s943_s18, 8 }
  0x42   : > { %s728_s8 = sshll.u32 %s188_s6, 5  ;;  %s198_s10 = scalar_lea.hbm %s1343_s0, %s744_s7 }
  0x43   : > { %p1359_p3 = scmp.ne.s32.totalorder %s1353_s25, 0  ;;  %s192_s13 = scalar_lea.vmem [#allocation2], %s728_s8 }
  0x44   : > { %s211_s14 = sshll.u32 %s192_s13, 4  ;;  %s948_s22 = smov 1024   ;;  %s212_s14 = int_to_ptr.vmem [resolvable:$true] %s211_s14 }
  0x45   : > { %s756_s12 = scalar_select %p1359_p3, [#allocation0], [#allocation15] }
  0x46   : > { %757 = sst [smem:[#allocation12]] (%p1359_p3), %s948_s22  ;;  %s949_s23 = smov 256  }
  0x47   : > { %s203_s20 = sld [smem:[%s756_s12]]   ;;  %s950_s30 = smov 2  }
  0x48   : > { %758 = sst [smem:[#allocation12 + $0x1]] (%p1359_p3), %s949_s23  ;;  %s951_s5 = smov 128  }
  0x49   : > { %759 = sst [smem:[#allocation12 + $0x2]] (%p1359_p3), %s950_s30  ;;  %s952_s8 = smov 8  }
  0x4a   : > { %760 = sst [smem:[#allocation12 + $0x3]] (%p1359_p3), %s951_s5  ;;  %s189_s11 = scalar_lea.sflag [#allocation3], %s188_s6 }
  0x4b   : > { %761 = sst [smem:[#allocation12 + $0x4]] (%p1359_p3), %s951_s5  ;;  %s953_s12 = smov 131072  }
  0x4c   : > { %762 = sst [smem:[#allocation12 + $0x5]] (%p1359_p3), %s952_s8 }
  0x4d   : > { %s731_s7 = sshll.u32 %s203_s20, 26 }
  0x4e   : > { %s732_s9 = sadd.s32 134217728, %s731_s7 }
  0x4f   : > { %763 = dma.general (%p1359_p3), %s198_s10, 512, %s212_s14, %s189_s11, %s953_s12, [#allocation12], %s732_s9, 0  }
  0x50 PF: > { %p1360_p0 = scmp.ne.s32.totalorder %s1357_s29, 0 }
  0x51   : > { %s1118_s13 = sand.u32 (!%p1360_p0), 1, %s935_s16   ;;  %p1361_p10 = scmp.ne.s32.totalorder (!%p1360_p0), %s1354_s26, 0 }
  0x52   : > { %236 = sbr.rel (%p1360_p0) target bundleno = 726 (0x2d6), region = 36  ;;  %s734_s20 = sshll.u32 (!%p1360_p0), %s1118_s13, 5 }
  0x53   : > { %s239_s22 = scalar_lea.sflag (!%p1360_p0), [#allocation3], %s1118_s13  ;;  %s242_s23 = scalar_lea.vmem (!%p1360_p0), [#allocation2], %s734_s20 }
  0x57   : > { %914 = dma.done.wait (%p1361_p10), %s239_s22, 512  }
  0x58   : > { %916 = vsyncadd (%p1361_p10), %s239_s22, 4294966784  ;;  %p1362_p1 = scmp.eq.s32.totalorder %s1009_s19, 0 }
  0x5a   : > { %918 = dma.done.wait (%p1362_p1), [#allocation5], 16   ;;  %p1363_p2 = pmov %p1362_p1 }
  0x5b   : > { %p1364_p7 = pmov %p1362_p1 }
  0x5c   : > { %920 = vsyncadd (%p1363_p2), [#allocation5], 4294967280 }
  0x5d   : > { %922 = dma.done.wait (%p1364_p7), [#allocation8], 32   ;;  %p1365_p4 = pmov %p1362_p1 }
  0x5f   : > { %924 = vsyncadd (%p1365_p4), [#allocation8], 4294967264 }
  0x60   : > { %259 = sfence }
  0x61   : > { %v1136_v0 = vld [vmem:[%s242_s23 + $0x10] sm:$0xff]  ;;  %vm288_vm0 = vcmask 1040384   ;;  %v1138_v1 = vld [vmem:[%s242_s23] sm:$0xff]  ;;  %v1140_v2 = vld [vmem:[%s242_s23 + $0x8] sm:$0xff]  ;;  %s954_s25 = smov 1   ;;  %s955_s26 = smov 127  }
  0x62   : > { %v292_v3 = vrot.slane %v1136_v0, 7  ;;  %v289_v4 = vrot.slane %v1138_v1, 7  ;;  %v290_v5 = vrot.slane %v1140_v2, 7  ;;  %v1145_v6 = vld [vmem:[%s242_s23 + $0x18] sm:$0xff]  ;;  %v302_v12 = vrot.slane %v1138_v1, 1  ;;  %s1221_s29 = smul.u32 9, %s1009_s19 }
  0x63   : > { %v293_v10 = vrot.slane %v1145_v6, 7  ;;  %v303_v13 = vrot.slane %v1140_v2, 1  ;;  %vm301_vm1 = vcmask 1046528   ;;  %v306_v16 = vrot.slane %v1145_v6, 1 }
  0x64   : > { %v1148_v7 = vsel %vm288_vm0, 0.0, %v292_v3  ;;  %v1151_v8 = vsel %vm288_vm0, 0.0, %v289_v4  ;;  %v1158_v9 = vsel %vm288_vm0, %v289_v4, %v290_v5  ;;  %v305_v17 = vrot.slane %v1136_v0, 1  ;;  %s340_s6 = sadd.s32 1, %s1221_s29  ;;  %s351_s14 = sadd.s32 2, %s1221_s29 }
  0x65   : > { %322 = vrot.lane.b32.xlu1 %v1148_v7, %s954_s25  ;;  %318 = vrot.lane.b32.xlu0 %v1151_v8, %s954_s25  ;;  %v1166_v11 = vsel %vm288_vm0, %v292_v3, %v293_v10  ;;  %v1190_v14 = vsel %vm301_vm1, %v302_v12, %v303_v13  ;;  %v1196_v15 = vsel %vm301_vm1, %v303_v13, 0.0  ;;  %v1204_v18 = vsel %vm301_vm1, %v306_v16, 0.0  ;;  %s341_s10 = sld [smem:[#allocation6 + %s340_s6]]  ;;  %s379_s5 = sadd.s32 3, %s1221_s29 }
  0x66   : > { %v1206_v19 = vsel %vm301_vm1, %v305_v17, %v306_v16  ;;  %s315_s30 = sld [smem:[#allocation6 + %s1221_s29]]  ;;  %s406_s8 = sadd.s32 4, %s1221_s29  ;;  %vm330_vm2 = vcmask 7168   ;;  %vm365_vm3 = vcmask 121856   ;;  %vm511_vm4 = vcmask 130048  }
  0x67   : > { %s352_s7 = sld [smem:[#allocation6 + %s351_s14]]  ;;  %s417_s12 = sadd.s32 5, %s1221_s29 }
  0x68   : > { %s380_s9 = sld [smem:[#allocation6 + %s379_s5]]  ;;  %s473_s22 = sadd.s32 7, %s1221_s29 }
  0x69   : > { %353 = vrot.lane.b32.xlu1 %v1151_v8, %s955_s26  ;;  %320 = vrot.lane.b32.xlu0 %v1158_v9, %s954_s25  ;;  %s407_s11 = sld [smem:[#allocation6 + %s406_s8]]  ;;  %s279_s8 = scalar_lea.vmem [#allocation10], %s734_s20 }
  0x6a   : > { %s1232_s23 = sld [smem:[#allocation6 + %s417_s12]] }
  0x6b   : > { %v342_v28 = vstv %s341_s10  ;;  %s484_s10 = sadd.s32 8, %s1221_s29  ;;  %s556_s5 = sld [smem:[#allocation7 + %s1009_s19]] }
  0x6c   : > { %v335_v29 = vstv %s315_s30  ;;  %v343_v33 = vmul.f32 %v342_v28, %v1151_v8  ;;  %v344_v41 = vmul.f32 %v342_v28, %v1158_v9  ;;  %v345_v51 = vmul.f32 %v342_v28, %v1148_v7  ;;  %s485_s14 = sld [smem:[#allocation6 + %s484_s10]] }
  0x6d   : > { %324 = vrot.lane.b32.xlu1 %v1166_v11, %s954_s25  ;;  %355 = vrot.lane.b32.xlu0 %v1158_v9, %s955_s26  ;;  %v370_v31 = vstv %s352_s7  ;;  %v346_v52 = vmul.f32 %v342_v28, %v1166_v11  ;;  %s561_s7 = sld [smem:[#allocation9 + %s1009_s19]] }
  0x6e   : > { %v397_v38 = vstv %s380_s9  ;;  %s582_s9 = scalar_lea.sflag [#allocation4], %s1118_s13 }
  0x6f   : > { %v408_v44 = vstv %s407_s11 }
  0x70   : > { %v435_v60 = vstv %s1232_s23  ;;  %v409_v61 = vmul.f32 %v408_v44, %v1138_v1 }
  0x71   : > { %381 = vrot.lane.b32.xlu1 %v1138_v1, %s954_s25  ;;  %357 = vrot.lane.b32.xlu0 %v1148_v7, %s955_s26 }
  0x75   : > { %359 = vrot.lane.b32.xlu1 %v1166_v11, %s955_s26  ;;  %383 = vrot.lane.b32.xlu0 %v1140_v2, %s954_s25 }
  0x79   : > { %387 = vrot.lane.b32.xlu1 %v1145_v6, %s954_s25  ;;  %385 = vrot.lane.b32.xlu0 %v1136_v0, %s954_s25 }
  0x7d   : > { %421 = vrot.lane.b32.xlu1 %v1140_v2, %s955_s26  ;;  %419 = vrot.lane.b32.xlu0 %v1138_v1, %s955_s26 }
  0x81   : > { %448 = vrot.lane.b32.xlu1 %v1190_v14, %s954_s25  ;;  %423 = vrot.lane.b32.xlu0 %v1136_v0, %s955_s26 }
  0x85   : > { %425 = vrot.lane.b32.xlu1 %v1145_v6, %s955_s26  ;;  %450 = vrot.lane.b32.xlu0 %v1196_v15, %s954_s25 }
  0x89   : > { %454 = vrot.lane.b32.xlu1 %v1204_v18, %s954_s25  ;;  %452 = vrot.lane.b32.xlu0 %v1206_v19, %s954_s25  ;;  %s444_s25 = sadd.s32 6, %s1221_s29 }
  0x8a   : > { %s1240_s6 = sld [smem:[#allocation6 + %s444_s25]] }
  0x8d   : > { %488 = vrot.lane.b32.xlu1 %v1196_v15, %s955_s26  ;;  %486 = vrot.lane.b32.xlu0 %v1190_v14, %s955_s26 }
  0x90   : > { %v464_v17 = vstv %s1240_s6 }
  0x91   : > { %492 = vrot.lane.b32.xlu1 %v1204_v18, %s955_s26  ;;  %490 = vrot.lane.b32.xlu0 %v1206_v19, %s955_s26  ;;  %s1236_s26 = sld [smem:[#allocation6 + %s473_s22]] }
  0x97   : > { %v475_v12 = vstv %s1236_s26 }
  0xd7   : > { %v323_v20 = vpop.permute.xlu1 %322  ;;  %v319_v21 = vpop.permute.xlu0 %318 }
  0xd8   : > { %v331_v30 = vsel %vm330_vm2, 0.0, %v319_v21  ;;  %v333_v42 = vsel %vm330_vm2, 0.0, %v323_v20 }
  0xd9   : > { %v336_v34 = vmul.f32 %v335_v29, %v331_v30  ;;  %v338_v58 = vmul.f32 %v335_v29, %v333_v42  ;;  %v476_v30 = vmul.f32 %v475_v12, %v1190_v14 }
  0xdb   : > { %v354_v22 = vpop.permute.xlu1 %353  ;;  %v321_v23 = vpop.permute.xlu0 %320  ;;  %v347_v45 = vadd.f32 %v343_v33, %v336_v34  ;;  %v349_v20 = vadd.f32 %v345_v51, %v338_v58 }
  0xdc   : > { %v366_v32 = vsel %vm365_vm3, %v354_v22, 0.0  ;;  %v332_v37 = vsel %vm330_vm2, 0.0, %v321_v23 }
  0xdd   : > { %v371_v40 = vmul.f32 %v370_v31, %v366_v32  ;;  %v337_v46 = vmul.f32 %v335_v29, %v332_v37 }
  0xdf   : > { %v325_v24 = vpop.permute.xlu1 %324  ;;  %v356_v25 = vpop.permute.xlu0 %355  ;;  %v375_v54 = vadd.f32 %v371_v40, %v347_v45  ;;  %v348_v62 = vadd.f32 %v344_v41, %v337_v46  ;;  %v477_v46 = vmul.f32 %v475_v12, %v1196_v15 }
  0xe0   : > { %v367_v43 = vsel %vm365_vm3, %v356_v25, 0.0  ;;  %v334_v47 = vsel %vm330_vm2, 0.0, %v325_v24 }
  0xe1   : > { %v372_v55 = vmul.f32 %v370_v31, %v367_v43  ;;  %v339_v59 = vmul.f32 %v335_v29, %v334_v47  ;;  %v412_v43 = vmul.f32 %v408_v44, %v1145_v6 }
  0xe3   : > { %v382_v26 = vpop.permute.xlu1 %381  ;;  %v358_v27 = vpop.permute.xlu0 %357  ;;  %v376_v13 = vadd.f32 %v372_v55, %v348_v62  ;;  %v350_v21 = vadd.f32 %v346_v52, %v339_v59  ;;  %v479_v55 = vmul.f32 %v475_v12, %v1204_v18  ;;  %v478_v59 = vmul.f32 %v475_v12, %v1206_v19 }
  0xe4   : > { %v393_v39 = vsel %vm330_vm2, 0.0, %v382_v26  ;;  %v368_v56 = vsel %vm365_vm3, %v358_v27, 0.0  ;;  %v410_v26 = vmul.f32 %v408_v44, %v1140_v2 }
  0xe5   : > { %v398_v48 = vmul.f32 %v397_v38, %v393_v39  ;;  %v373_v8 = vmul.f32 %v370_v31, %v368_v56 }
  0xe7   : > { %v360_v35 = vpop.permute.xlu1 %359  ;;  %v384_v36 = vpop.permute.xlu0 %383  ;;  %v402_v63 = vadd.f32 %v398_v48, %v375_v54 }
  0xe8   : > { %v394_v53 = vsel %vm330_vm2, 0.0, %v384_v36  ;;  %v369_v57 = vsel %vm365_vm3, %v360_v35, 0.0 }
  0xe9   : > { %v399_v3 = vmul.f32 %v397_v38, %v394_v53  ;;  %v374_v9 = vmul.f32 %v370_v31, %v369_v57  ;;  %v413_v27 = vadd.f32 %v409_v61, %v402_v63  ;;  %v377_v31 = vadd.f32 %v373_v8, %v349_v20 }
  0xeb   : > { %v388_v49 = vpop.permute.xlu1 %387  ;;  %v386_v50 = vpop.permute.xlu0 %385  ;;  %v403_v24 = vadd.f32 %v399_v3, %v376_v13  ;;  %v378_v32 = vadd.f32 %v374_v9, %v350_v21 }
  0xec   : > { %v395_v4 = vsel %vm330_vm2, 0.0, %v386_v50  ;;  %v396_v10 = vsel %vm330_vm2, 0.0, %v388_v49 }
  0xed   : > { %v400_v22 = vmul.f32 %v397_v38, %v395_v4  ;;  %v401_v25 = vmul.f32 %v397_v38, %v396_v10  ;;  %v411_v38 = vmul.f32 %v408_v44, %v1136_v0  ;;  %v414_v41 = vadd.f32 %v410_v26, %v403_v24 }
  0xef   : > { %v422_v5 = vpop.permute.xlu1 %421  ;;  %v420_v7 = vpop.permute.xlu0 %419  ;;  %v404_v39 = vadd.f32 %v400_v22, %v377_v31  ;;  %v405_v40 = vadd.f32 %v401_v25, %v378_v32 }
  0xf0   : > { %v431_v11 = vsel %vm365_vm3, %v420_v7, 0.0  ;;  %v432_v23 = vsel %vm365_vm3, %v422_v5, 0.0  ;;  %v502_v5 = vstv %s485_s14 }
  0xf1   : > { %v436_v16 = vmul.f32 %v435_v60, %v431_v11  ;;  %v437_v34 = vmul.f32 %v435_v60, %v432_v23  ;;  %v415_v54 = vadd.f32 %v411_v38, %v404_v39  ;;  %v416_v56 = vadd.f32 %v412_v43, %v405_v40 }
  0xf3   : > { %v449_v28 = vpop.permute.xlu1 %448  ;;  %v424_v29 = vpop.permute.xlu0 %423  ;;  %v440_v35 = vadd.f32 %v436_v16, %v413_v27  ;;  %v441_v50 = vadd.f32 %v437_v34, %v414_v41 }
  0xf4   : > { %v460_v33 = vsel %vm330_vm2, 0.0, %v449_v28  ;;  %v433_v37 = vsel %vm365_vm3, %v424_v29, 0.0 }
  0xf5   : > { %v465_v36 = vmul.f32 %v464_v17, %v460_v33  ;;  %v438_v47 = vmul.f32 %v435_v60, %v433_v37 }
  0xf7   : > { %v469_v42 = vadd.f32 %v465_v36, %v440_v35  ;;  %v426_v45 = vpop.permute.xlu1 %425  ;;  %v451_v14 = vpop.permute.xlu0 %450  ;;  %v442_v61 = vadd.f32 %v438_v47, %v415_v54 }
  0xf8   : > { %v434_v48 = vsel %vm365_vm3, %v426_v45, 0.0  ;;  %v461_v49 = vsel %vm330_vm2, 0.0, %v451_v14 }
  0xf9   : > { %v439_v51 = vmul.f32 %v435_v60, %v434_v48  ;;  %v466_v52 = vmul.f32 %v464_v17, %v461_v49  ;;  %v480_v53 = vadd.f32 %v476_v30, %v469_v42 }
  0xfb   : > { %v470_v57 = vadd.f32 %v466_v52, %v441_v50  ;;  %v455_v58 = vpop.permute.xlu1 %454  ;;  %v453_v44 = vpop.permute.xlu0 %452  ;;  %v443_v63 = vadd.f32 %v439_v51, %v416_v56 }
  0xfc   : > { %v463_v15 = vsel %vm330_vm2, 0.0, %v455_v58  ;;  %v462_v62 = vsel %vm330_vm2, 0.0, %v453_v44 }
  0xfd   : > { %v468_v3 = vmul.f32 %v464_v17, %v463_v15  ;;  %v467_v4 = vmul.f32 %v464_v17, %v462_v62  ;;  %v481_v60 = vadd.f32 %v477_v46, %v470_v57 }
  0xff   : > { %v472_v7 = vadd.f32 %v468_v3, %v443_v63  ;;  %v471_v8 = vadd.f32 %v467_v4, %v442_v61  ;;  %v489_v9 = vpop.permute.xlu1 %488  ;;  %v487_v18 = vpop.permute.xlu0 %486 }
 0x100   : > { %v499_v10 = vsel %vm365_vm3, %v489_v9, 0.0  ;;  %v498_v11 = vsel %vm365_vm3, %v487_v18, 0.0 }
 0x101   : > { %v504_v13 = vmul.f32 %v502_v5, %v499_v10  ;;  %v503_v19 = vmul.f32 %v502_v5, %v498_v11  ;;  %v483_v12 = vadd.f32 %v479_v55, %v472_v7  ;;  %v482_v16 = vadd.f32 %v478_v59, %v471_v8 }
 0x102   : > { %v559_v8 = vstv %s556_s5  ;;  %v563_v10 = vstv %s561_s7 }
 0x103   : > { %v1275_v20 = vadd.f32 %v504_v13, %v481_v60  ;;  %v1277_v21 = vadd.f32 %v503_v19, %v480_v53  ;;  %v493_v17 = vpop.permute.xlu1 %492  ;;  %v491_v22 = vpop.permute.xlu0 %490 }
 0x104   : > { %v501_v23 = vsel %vm365_vm3, %v493_v17, 0.0  ;;  %v500_v24 = vsel %vm365_vm3, %v491_v22, 0.0 }
 0x105   : > { %v506_v25 = vmul.f32 %v502_v5, %v501_v23  ;;  %v505_v26 = vmul.f32 %v502_v5, %v500_v24  ;;  %v512_v27 = vsel %vm511_vm4, %v1277_v21, 0.0  ;;  %v513_v28 = vsel %vm511_vm4, %v1275_v20, 0.0 }
 0x106   : > { %v514_v31 = vadd.f32 %v513_v28, %v512_v27 }
 0x107   : > { %v510_v29 = vadd.f32 %v506_v25, %v483_v12  ;;  %v509_v30 = vadd.f32 %v505_v26, %v482_v16 }
 0x109   : > { %v515_v32 = vsel %vm511_vm4, %v509_v30, 0.0  ;;  %v517_v34 = vsel %vm511_vm4, %v510_v29, 0.0 }
 0x10a   : > { %v516_v33 = vadd.f32 %v515_v32, %v514_v31 }
 0x10c   : > { %v518_v35 = vadd.f32 %v517_v34, %v516_v33 }
 0x10e   : > { %519 = vadd.xlane.f32.xlu0 %v518_v35 }
 0x197   : > { %v520_v36 = vpop.xlane.xlu0 %519 }
 0x198   : > { %v521_v37 = vrot.slane %v520_v36, 4 }
 0x19a   : > { %v522_v39 = vadd.f32 %v521_v37, %v520_v36 }
 0x19c   : > { %v523_v38 = vrot.slane %v522_v39, 2 }
 0x19e   : > { %v524_v40 = vadd.f32 %v523_v38, %v522_v39 }
 0x1a0   : > { %v525_v41 = vrot.slane %v524_v40, 1 }
 0x1a2   : > { %v526_v42 = vadd.f32 %v525_v41, %v524_v40 }
 0x1a4   : > { %746 = vpush %v526_v42 }
 0x1d5   : > { %s747_s29 = spop %746 }
 0x1d6   : > { %v528_v43 = vstv %s747_s29 }
 0x1d7   : > { %v529_v45 = vmul.f32 0.001953125, %v528_v43 }
 0x1d9   : > { %v530_v14 = vsub.f32 %v1277_v21, %v529_v45  ;;  %v531_v46 = vsub.f32 %v1275_v20, %v529_v45  ;;  %v532_v47 = vsub.f32 %v509_v30, %v529_v45  ;;  %v533_v48 = vsub.f32 %v510_v29, %v529_v45 }
 0x1db   : > { %v534_v49 = vmul.f32 %v530_v14, %v530_v14  ;;  %v535_v50 = vmul.f32 %v531_v46, %v531_v46  ;;  %v536_v51 = vmul.f32 %v532_v47, %v532_v47  ;;  %v537_v52 = vmul.f32 %v533_v48, %v533_v48 }
 0x1dd   : > { %v538_v53 = vsel %vm511_vm4, %v534_v49, 0.0  ;;  %v539_v54 = vsel %vm511_vm4, %v535_v50, 0.0  ;;  %v541_v56 = vsel %vm511_vm4, %v536_v51, 0.0  ;;  %v543_v58 = vsel %vm511_vm4, %v537_v52, 0.0 }
 0x1de   : > { %v540_v55 = vadd.f32 %v539_v54, %v538_v53 }
 0x1e0   : > { %v542_v57 = vadd.f32 %v541_v56, %v540_v55 }
 0x1e2   : > { %v544_v44 = vadd.f32 %v543_v58, %v542_v57 }
 0x1e4   : > { %545 = vadd.xlane.f32.xlu1 %v544_v44 }
 0x26d   : > { %v546_v59 = vpop.xlane.xlu1 %545 }
 0x26e   : > { %v547_v61 = vrot.slane %v546_v59, 4 }
 0x270   : > { %v548_v15 = vadd.f32 %v547_v61, %v546_v59 }
 0x272   : > { %v549_v62 = vrot.slane %v548_v15, 2 }
 0x274   : > { %v550_v63 = vadd.f32 %v549_v62, %v548_v15 }
 0x276   : > { %v551_v3 = vrot.slane %v550_v63, 1 }
 0x278   : > { %v552_v4 = vadd.f32 %v551_v3, %v550_v63 }
 0x27a   : > { %748 = vpush %v552_v4 }
 0x2ab   : > { %s749_s30 = spop %748 }
 0x2ac   : > { %v554_v60 = vstv %s749_s30 }
 0x2ad   : > { %v555_v5 = vmul.f32 0.001953125, %v554_v60 }
 0x2af   : > { %v557_v7 = vadd.f32 1e-05, %v555_v5 }
 0x2b1   : > { %850 = vrsqrt.f32 %v557_v7 }
 0x2be   : > { %v851_v9 = vpop.eup %850 }
 0x2bf   : > { %v560_v18 = vmul.f32 %v851_v9, %v559_v8 }
 0x2c1   : > { %v562_v11 = vmul.f32 %v560_v18, %v529_v45  ;;  %v565_v13 = vmul.f32 %v560_v18, %v1277_v21  ;;  %v566_v12 = vmul.f32 %v560_v18, %v1275_v20  ;;  %v567_v16 = vmul.f32 %v560_v18, %v509_v30 }
 0x2c2   : > { %v568_v17 = vmul.f32 %v560_v18, %v510_v29 }
 0x2c3   : > { %v564_v19 = vsub.f32 %v563_v10, %v562_v11 }
 0x2c5   : > { %v569_v22 = vadd.f32 %v565_v13, %v564_v19  ;;  %v570_v23 = vadd.f32 %v566_v12, %v564_v19  ;;  %v571_v24 = vadd.f32 %v567_v16, %v564_v19  ;;  %v572_v25 = vadd.f32 %v568_v17, %v564_v19 }
 0x2c7   : > { %v573_v26 = vmax.f32 %v1138_v1, %v569_v22  ;;  %v574_v27 = vmax.f32 %v1140_v2, %v570_v23  ;;  %v575_v28 = vmax.f32 %v1136_v0, %v571_v24  ;;  %v576_v31 = vmax.f32 %v1145_v6, %v572_v25 }
 0x2c9   : > { %577 = vst.msk [vmem:[%s279_s8] sm:$0xff] %vm511_vm4, %v573_v26  ;;  %578 = vst.msk [vmem:[%s279_s8 + $0x8] sm:$0xff] %vm511_vm4, %v574_v27 }
 0x2ca   : > { %579 = vst.msk [vmem:[%s279_s8 + $0x10] sm:$0xff] %vm511_vm4, %v575_v28  ;;  %580 = vst.msk [vmem:[%s279_s8 + $0x18] sm:$0xff] %vm511_vm4, %v576_v31 }
 0x2cb   : > { %s745_s11 = sshll.u32 %s1009_s19, 8  ;;  %s605_s12 = sshll.u32 %s279_s8, 4  ;;  %s606_s12 = int_to_ptr.vmem [resolvable:$true] %s605_s12 }
 0x2cc   : > { %s594_s23 = scalar_lea.hbm %s1347_s4, %s745_s11  ;;  %s956_s25 = smov 256  }
 0x2cd   : > { %p1366_p8 = scmp.ne.s32.totalorder %s1355_s27, 0  ;;  %s957_s26 = smov 1024  }
 0x2ce   : > { %s958_s13 = smov 2   ;;  %s959_s6 = smov 128  }
 0x2cf   : > { %771 = sst [smem:[#allocation14]] (%p1366_p8), %s956_s25  ;;  %s960_s19 = smov 8  }
 0x2d0   : > { %772 = sst [smem:[#allocation14 + $0x1]] (%p1366_p8), %s957_s26  ;;  %s961_s10 = smov 131072  }
 0x2d1   : > { %773 = sst [smem:[#allocation14 + $0x2]] (%p1366_p8), %s958_s13  ;;  %s962_s14 = smov 0  }
 0x2d2   : > { %774 = sst [smem:[#allocation14 + $0x3]] (%p1366_p8), %s959_s6 }
 0x2d3   : > { %775 = sst [smem:[#allocation14 + $0x4]] (%p1366_p8), %s959_s6 }
 0x2d4   : > { %776 = sst [smem:[#allocation14 + $0x5]] (%p1366_p8), %s960_s19 }
 0x2d5   : > { %777 = dma.general (%p1366_p8), %s606_s12, 512, %s594_s23, %s582_s9, %s961_s10, [#allocation14], %s962_s14, 0  }
 0x2d6 PF: > { %p799_p12 = scmp.ge.s32.totalorder %s943_s18, 2  ;;  %s633_s29 = sand.u32 1, %s931_s15  }
 0x2d7   : > { %p1367_p11 = scmp.ne.s32.totalorder %s1356_s28, 0  ;;  %s634_s30 = scalar_lea.sflag [#allocation4], %s633_s29 }
 0x2d9   : > { %p790_p9 = pnand %p799_p12, %p1367_p11 }
 0x2db   : > { %p791_p5 = pneg %p790_p9 }
 0x2dd   : > { %926 = dma.done.wait (%p791_p5), %s634_s30, 512  }
 0x2de   : > { %928 = vsyncadd (%p791_p5), %s634_s30, 4294966784  ;;  %p19_p6 = scmp.ge.s32.totalorder %s1013_s21, 6   ;;  %s1368_s15 = smov %s935_s16 }
 0x2df   : > { %s1369_s16 = smov %s939_s17  ;;  %s1370_s17 = smov %s1025_s24 }
 0x2e0   : > { %s1371_s18 = smov %s1013_s21  ;;  %21 = sbr.rel (!%p19_p6) target bundleno = 7 (0x7), region = 104 }
 0x2e5   :  { %639 = vsyncpa [#allocation3], 1 }
 0x2e6   :  { %641 = vsyncpa [#allocation3 + $0x1], 1 }
 0x2e7   :  { %642 = vsyncpa [#allocation4], 1 }
 0x2e8   :  { %644 = vsyncpa [#allocation4 + $0x1], 1 }
 0x2e9   :  { %645 = vsyncpa [#allocation5], 1 }
 0x2ea   :  { %647 = vsyncpa [#allocation5 + $0x1], 1 }
 0x2eb   :  { %648 = vsyncpa [#allocation8], 1 }

</bundles_post_ra>
